<compile_context>
chip_gen: v5e
topology: v5e:2x2
jax: 0.10.0
libtpu: 0.0.40
codegen_flags: <defaults>
</compile_context>

<pallas_src>
import functools
import math

import jax
import jax.numpy as jnp
from jax.experimental import pallas as pl
from jax.experimental.pallas import tpu as pltpu

LATENT_DIM = 10
H1, H2, H3 = 40, 70, 90
OUTPUT_DIM = 361

# Lane-aligned (padded) sizes used inside the kernel.
H_PAD = 128          # 40/70/90 all pad to one 128-lane vreg width
OUT_PAD = 384        # next multiple of 128 >= 361

SOFTPLUS_BETA = 3.0
SOFTPLUS_THRESHOLD = 20.0

MAX_TILE_ROWS = 2048   # keeps the f32 (tb,384) double-buffered output + live
                       # intermediates within v5e's 16 MiB default scoped VMEM
MIN_SPLIT_ROWS = 1024  # only split a one-tile batch in two (for v7x megacore)
                       # when each half still has >= this many rows of work


def _round_up(x, m):
    return ((x + m - 1) // m) * m


def _softplus_beta(v, exp_dtype):
    """PyTorch nn.Softplus(beta=3, threshold=20), branchless & overflow-free.

    relu(v) + (1/beta)*log1p(exp(-|beta*v|)) never overflows; the explicit
    threshold select preserves PyTorch's exact identity region.  The exp()
    runs on the EUP in `exp_dtype` (bf16 on v6e/v7x halves EUP pressure;
    the surrounding adds / log1p stay f32).
    """
    bv = SOFTPLUS_BETA * v
    e = jnp.exp((-jnp.abs(bv)).astype(exp_dtype)).astype(jnp.float32)
    sp = jnp.maximum(v, 0.0) + (1.0 / SOFTPLUS_BETA) * jnp.log1p(e)
    return jnp.where(bv > SOFTPLUS_THRESHOLD, v, sp)


def decoder_kernel(
    x_ref,
    w1_ref, b1_ref,
    w2_ref, b2_ref,
    w3_ref, b3_ref,
    w4_ref, b4_ref,
    out_ref,
    *,
    compute_dtype,
):
    # Matmul operands in compute_dtype (bf16 by default -> MXU-native),
    # accumulation always f32; biases stay f32.
    x = x_ref[...].astype(compute_dtype)

    h = jnp.dot(x, w1_ref[...], preferred_element_type=jnp.float32) + b1_ref[...]
    h = _softplus_beta(h, compute_dtype)

    h = jnp.dot(h.astype(compute_dtype), w2_ref[...],
                preferred_element_type=jnp.float32) + b2_ref[...]
    h = _softplus_beta(h, compute_dtype)

    h = jnp.dot(h.astype(compute_dtype), w3_ref[...],
                preferred_element_type=jnp.float32) + b3_ref[...]
    h = _softplus_beta(h, compute_dtype)

    out = jnp.dot(h.astype(compute_dtype), w4_ref[...],
                  preferred_element_type=jnp.float32) + b4_ref[...]
    out_ref[...] = out.astype(out_ref.dtype)


_Buffered = getattr(pl, "Buffered", None)


def _resident_spec(shape):
    """Full-array block, constant index -> stays in VMEM across grid steps.

    Single-buffered: a constant index map never re-DMAs, so the default
    double buffer would just waste a second VMEM copy.
    """
    index_map = lambda i: (0,) * len(shape)
    if _Buffered is not None:
        try:
            return pl.BlockSpec(shape, index_map, pipeline_mode=_Buffered(1))
        except TypeError:  # older jax without pipeline_mode kwarg
            pass
    return pl.BlockSpec(shape, index_map)


def _choose_tile_rows(batch, block_rows):
    """Pick the batch-tile size (always a multiple of 8)."""
    b8 = _round_up(max(batch, 1), 8)
    max_tb = max(8, min(_round_up(block_rows, 8), MAX_TILE_ROWS))
    if b8 <= max_tb:
        # Whole batch fits in one tile.  For big batches split in two so the
        # ("parallel",) grid keeps both v7x TensorCores busy.
        if b8 >= 2 * MIN_SPLIT_ROWS:
            return _round_up((b8 + 1) // 2, 8)
        return b8
    return max_tb


def decoder_forward(x, padded_params, *, block_rows=2048,
                    out_dtype=jnp.float32, slice_output=True):
    """x: (B, LATENT_DIM) float32 -> (B, OUTPUT_DIM) `out_dtype`.

    With slice_output=False the raw lane-dense (b_pad, 384) buffer is returned
    (rows >= B and lanes >= 361 are padding); this avoids a standalone HBM
    re-read/re-write of the largest stream when the consumer can index it.
    Pass out_dtype=jnp.bfloat16 to halve output HBM traffic if downstream
    tolerates it.
    """
    B = x.shape[0]
    w1, b1, w2, b2, w3, b3, w4, b4 = padded_params
    compute_dtype = w1.dtype

    tb = _choose_tile_rows(B, block_rows)
    b_pad = _round_up(B, tb)
    if b_pad != B:
        x = jnp.pad(x, ((0, b_pad - B), (0, 0)))
    grid = (b_pad // tb,)

    weight_bytes = sum(
        int(a.size) * a.dtype.itemsize for a in (w1, b1, w2, b2, w3, b3, w4, b4)
    )
    cost = pl.CostEstimate(
        flops=2 * b_pad * (LATENT_DIM * H1 + H1 * H2 + H2 * H3 + H3 * OUTPUT_DIM),
        transcendentals=2 * b_pad * (H1 + H2 + H3),
        bytes_accessed=weight_bytes
        + b_pad * LATENT_DIM * x.dtype.itemsize
        + b_pad * OUT_PAD * jnp.dtype(out_dtype).itemsize,
    )

    kernel = functools.partial(decoder_kernel, compute_dtype=compute_dtype)

    out = pl.pallas_call(
        kernel,
        out_shape=jax.ShapeDtypeStruct((b_pad, OUT_PAD), out_dtype),
        grid=grid,
        in_specs=[
            # (tb, 10) input block: last dim equals the full array dim, so the
            # HBM read is one contiguous DMA.  Deliberately NOT pre-padded to
            # 128 lanes in HBM (that would 12.8x the input DMA bytes).
            pl.BlockSpec((tb, LATENT_DIM), lambda i: (i, 0)),
            _resident_spec(w1.shape), _resident_spec(b1.shape),
            _resident_spec(w2.shape), _resident_spec(b2.shape),
            _resident_spec(w3.shape), _resident_spec(b3.shape),
            _resident_spec(w4.shape), _resident_spec(b4.shape),
        ],
        out_specs=pl.BlockSpec((tb, OUT_PAD), lambda i: (i, 0)),
        compiler_params=pltpu.CompilerParams(
            dimension_semantics=("parallel",)
        ),
        cost_estimate=cost,
    )(x, w1, b1, w2, b2, w3, b3, w4, b4)

    if not slice_output:
        return out
    return out[:B, :OUTPUT_DIM]


# ---------------------------------------------------------------------------
# Parameter construction (PyTorch-style init) + zero padding for the kernel.
# ---------------------------------------------------------------------------

def init_linear(key, fan_in, fan_out):
    """PyTorch nn.Linear default init: U(-1/sqrt(fan_in), 1/sqrt(fan_in)).

    Returns (W, b) with W shaped (fan_in, fan_out) [transposed vs torch] and
    b shaped (1, fan_out).
    """
    kw, kb = jax.random.split(key)
    bound = 1.0 / math.sqrt(fan_in)
    w = jax.random.uniform(kw, (fan_in, fan_out), jnp.float32, -bound, bound)
    b = jax.random.uniform(kb, (1, fan_out), jnp.float32, -bound, bound)
    return w, b


def init_decoder_params(key):
    k1, k2, k3, k4 = jax.random.split(key, 4)
    return (
        init_linear(k1, LATENT_DIM, H1),
        init_linear(k2, H1, H2),
        init_linear(k3, H2, H3),
        init_linear(k4, H3, OUTPUT_DIM),
    )


def _pad2(a, rows, cols):
    r, c = a.shape
    return jnp.pad(a, ((0, rows - r), (0, cols - c)))


def pad_decoder_params(params, weight_dtype=jnp.bfloat16):
    """Zero-pad weights/biases to lane-aligned shapes (mathematically inert).

    Padding MUST stay exactly zero: padded hidden lanes produce
    softplus(0)=log(2)/3, which is annihilated only by zero rows in the next
    weight matrix.  Weights are cast to `weight_dtype` (bf16 by default for
    MXU-native matmuls); biases stay f32 (added to the f32 accumulator).
    """
    (w1, b1), (w2, b2), (w3, b3), (w4, b4) = params

    def pw(w, rows, cols):
        return _pad2(w, rows, cols).astype(weight_dtype)

    def pb(b, cols):
        return _pad2(b, 1, cols).astype(jnp.float32)

    return (
        pw(w1, LATENT_DIM, H_PAD), pb(b1, H_PAD),
        pw(w2, H_PAD, H_PAD),      pb(b2, H_PAD),
        pw(w3, H_PAD, H_PAD),      pb(b3, H_PAD),
        pw(w4, H_PAD, OUT_PAD),    pb(b4, OUT_PAD),
    )


def decoder_reference(x, params):
    """Plain-JAX f32 reference (unpadded params) for correctness checking."""
    (w1, b1), (w2, b2), (w3, b3), (w4, b4) = params

    def sp(v):
        bv = SOFTPLUS_BETA * v
        s = jnp.maximum(v, 0.0) + (1.0 / SOFTPLUS_BETA) * jnp.log1p(jnp.exp(-jnp.abs(bv)))
        return jnp.where(bv > SOFTPLUS_THRESHOLD, v, s)

    h = sp(x @ w1 + b1)
    h = sp(h @ w2 + b2)
    h = sp(h @ w3 + b3)
    return h @ w4 + b4


if __name__ == "__main__":
    key = jax.random.PRNGKey(0)
    k_params, k_x1, k_x2 = jax.random.split(key, 3)

    params = init_decoder_params(k_params)
    padded_f32 = pad_decoder_params(params, weight_dtype=jnp.float32)
    padded_bf16 = pad_decoder_params(params, weight_dtype=jnp.bfloat16)

    # Case 1: small batch, f32 path (single grid step) -> exact 1e-5 match.
    batch = 8
    x = jax.random.normal(k_x1, (batch, LATENT_DIM), jnp.float32)
    out = jax.block_until_ready(decoder_forward(x, padded_f32))
    ref = decoder_reference(x, params)
    assert out.shape == (batch, OUTPUT_DIM), out.shape
    assert jnp.allclose(out, ref, atol=1e-5, rtol=1e-5), (
        float(jnp.max(jnp.abs(out - ref)))
    )

    # Case 2: batch not divisible by the tile (grid > 1 + row padding), f32.
    batch2 = 100
    x2 = jax.random.normal(k_x2, (batch2, LATENT_DIM), jnp.float32)
    out2 = jax.block_until_ready(decoder_forward(x2, padded_f32, block_rows=64))
    ref2 = decoder_reference(x2, params)
    assert out2.shape == (batch2, OUTPUT_DIM), out2.shape
    assert jnp.allclose(out2, ref2, atol=1e-5, rtol=1e-5), (
        float(jnp.max(jnp.abs(out2 - ref2)))
    )

    # Case 3: fast path — bf16 matmuls / bf16 EUP exp, padded lane-dense
    # output returned without the standalone slice.  Looser tolerance (bf16).
    out3 = jax.block_until_ready(
        decoder_forward(x2, padded_bf16, slice_output=False)
    )
    assert out3.shape[1] == OUT_PAD, out3.shape
    valid = out3[:batch2, :OUTPUT_DIM]
    assert jnp.allclose(valid, ref2, atol=1e-1, rtol=1e-1), (
        float(jnp.max(jnp.abs(valid - ref2)))
    )

    print("KERNEL_OK")
</pallas_src>

<mosaic_0001>
module attributes {stable_mosaic.version = 11 : i64} {
  func.func @decoder_kernel(%arg0: i32, %arg1: memref<8x10xf32, #tpu.memory_space<vmem>>, %arg2: memref<10x128xf32, #tpu.memory_space<vmem>>, %arg3: memref<1x128xf32, #tpu.memory_space<vmem>>, %arg4: memref<128x128xf32, #tpu.memory_space<vmem>>, %arg5: memref<1x128xf32, #tpu.memory_space<vmem>>, %arg6: memref<128x128xf32, #tpu.memory_space<vmem>>, %arg7: memref<1x128xf32, #tpu.memory_space<vmem>>, %arg8: memref<128x384xf32, #tpu.memory_space<vmem>>, %arg9: memref<1x384xf32, #tpu.memory_space<vmem>>, %arg10: memref<8x384xf32, #tpu.memory_space<vmem>>) attributes {dimension_semantics = [#tpu.dimension_semantics<parallel>], iteration_bounds = array<i64: 1>, scalar_prefetch = 0 : i64, scratch_operands = 0 : i64, tpu.core_type = #tpu.core_type<tc>, window_params = [{transform_indices = @transform_0, window_bounds = array<i64: 8, 10>}, {pipeline_mode = #tpu.pipeline_mode<synchronous>, transform_indices = @transform_1, window_bounds = array<i64: 10, 128>}, {pipeline_mode = #tpu.pipeline_mode<synchronous>, transform_indices = @transform_2, window_bounds = array<i64: 1, 128>}, {pipeline_mode = #tpu.pipeline_mode<synchronous>, transform_indices = @transform_3, window_bounds = array<i64: 128, 128>}, {pipeline_mode = #tpu.pipeline_mode<synchronous>, transform_indices = @transform_4, window_bounds = array<i64: 1, 128>}, {pipeline_mode = #tpu.pipeline_mode<synchronous>, transform_indices = @transform_5, window_bounds = array<i64: 128, 128>}, {pipeline_mode = #tpu.pipeline_mode<synchronous>, transform_indices = @transform_6, window_bounds = array<i64: 1, 128>}, {pipeline_mode = #tpu.pipeline_mode<synchronous>, transform_indices = @transform_7, window_bounds = array<i64: 128, 384>}, {pipeline_mode = #tpu.pipeline_mode<synchronous>, transform_indices = @transform_8, window_bounds = array<i64: 1, 384>}, {transform_indices = @transform_9, window_bounds = array<i64: 8, 384>}]} {
    %c0 = arith.constant 0 : index
    %c0_0 = arith.constant 0 : index
    %0 = vector.load %arg1[%c0, %c0_0] : memref<8x10xf32, #tpu.memory_space<vmem>>, vector<8x10xf32>
    %c0_1 = arith.constant 0 : index
    %c0_2 = arith.constant 0 : index
    %1 = vector.load %arg2[%c0_1, %c0_2] : memref<10x128xf32, #tpu.memory_space<vmem>>, vector<10x128xf32>
    %cst = arith.constant dense<0.000000e+00> : vector<8x128xf32>
    %2 = tpu.matmul %0, %1, %cst {dimension_numbers = #tpu.dot_dimension_numbers<[1], [0], [0], [1], [0, 0, 1, 1], [], []>} : vector<8x10xf32>, vector<10x128xf32>, vector<8x128xf32> -> vector<8x128xf32>
    %c0_3 = arith.constant 0 : index
    %c0_4 = arith.constant 0 : index
    %3 = vector.load %arg3[%c0_3, %c0_4] : memref<1x128xf32, #tpu.memory_space<vmem>>, vector<1x128xf32>
    %4 = vector.broadcast %3 : vector<1x128xf32> to vector<8x128xf32>
    %5 = arith.addf %2, %4 : vector<8x128xf32>
    %cst_5 = arith.constant 3.000000e+00 : f32
    %6 = vector.broadcast %cst_5 : f32 to vector<8x128xf32>
    %7 = arith.mulf %6, %5 : vector<8x128xf32>
    %8 = math.absf %7 : vector<8x128xf32>
    %cst_6 = arith.constant 0.000000e+00 : f32
    %9 = vector.broadcast %cst_6 : f32 to vector<8x128xf32>
    %10 = arith.subf %9, %8 : vector<8x128xf32>
    %11 = math.exp %10 : vector<8x128xf32>
    %cst_7 = arith.constant 0.000000e+00 : f32
    %12 = vector.broadcast %cst_7 : f32 to vector<8x128xf32>
    %13 = arith.maximumf %5, %12 : vector<8x128xf32>
    %14 = math.log1p %11 : vector<8x128xf32>
    %cst_8 = arith.constant 0.333333343 : f32
    %15 = vector.broadcast %cst_8 : f32 to vector<8x128xf32>
    %16 = arith.mulf %15, %14 : vector<8x128xf32>
    %17 = arith.addf %13, %16 : vector<8x128xf32>
    %cst_9 = arith.constant 2.000000e+01 : f32
    %18 = vector.broadcast %cst_9 : f32 to vector<8x128xf32>
    %19 = arith.cmpf ogt, %7, %18 : vector<8x128xf32>
    %20 = arith.select %19, %5, %17 : vector<8x128xi1>, vector<8x128xf32>
    %c0_10 = arith.constant 0 : index
    %c0_11 = arith.constant 0 : index
    %21 = vector.load %arg4[%c0_10, %c0_11] : memref<128x128xf32, #tpu.memory_space<vmem>>, vector<128x128xf32>
    %cst_12 = arith.constant dense<0.000000e+00> : vector<8x128xf32>
    %22 = tpu.matmul %20, %21, %cst_12 {dimension_numbers = #tpu.dot_dimension_numbers<[1], [0], [0], [1], [0, 0, 1, 1], [], []>} : vector<8x128xf32>, vector<128x128xf32>, vector<8x128xf32> -> vector<8x128xf32>
    %c0_13 = arith.constant 0 : index
    %c0_14 = arith.constant 0 : index
    %23 = vector.load %arg5[%c0_13, %c0_14] : memref<1x128xf32, #tpu.memory_space<vmem>>, vector<1x128xf32>
    %24 = vector.broadcast %23 : vector<1x128xf32> to vector<8x128xf32>
    %25 = arith.addf %22, %24 : vector<8x128xf32>
    %cst_15 = arith.constant 3.000000e+00 : f32
    %26 = vector.broadcast %cst_15 : f32 to vector<8x128xf32>
    %27 = arith.mulf %26, %25 : vector<8x128xf32>
    %28 = math.absf %27 : vector<8x128xf32>
    %cst_16 = arith.constant 0.000000e+00 : f32
    %29 = vector.broadcast %cst_16 : f32 to vector<8x128xf32>
    %30 = arith.subf %29, %28 : vector<8x128xf32>
    %31 = math.exp %30 : vector<8x128xf32>
    %cst_17 = arith.constant 0.000000e+00 : f32
    %32 = vector.broadcast %cst_17 : f32 to vector<8x128xf32>
    %33 = arith.maximumf %25, %32 : vector<8x128xf32>
    %34 = math.log1p %31 : vector<8x128xf32>
    %cst_18 = arith.constant 0.333333343 : f32
    %35 = vector.broadcast %cst_18 : f32 to vector<8x128xf32>
    %36 = arith.mulf %35, %34 : vector<8x128xf32>
    %37 = arith.addf %33, %36 : vector<8x128xf32>
    %cst_19 = arith.constant 2.000000e+01 : f32
    %38 = vector.broadcast %cst_19 : f32 to vector<8x128xf32>
    %39 = arith.cmpf ogt, %27, %38 : vector<8x128xf32>
    %40 = arith.select %39, %25, %37 : vector<8x128xi1>, vector<8x128xf32>
    %c0_20 = arith.constant 0 : index
    %c0_21 = arith.constant 0 : index
    %41 = vector.load %arg6[%c0_20, %c0_21] : memref<128x128xf32, #tpu.memory_space<vmem>>, vector<128x128xf32>
    %cst_22 = arith.constant dense<0.000000e+00> : vector<8x128xf32>
    %42 = tpu.matmul %40, %41, %cst_22 {dimension_numbers = #tpu.dot_dimension_numbers<[1], [0], [0], [1], [0, 0, 1, 1], [], []>} : vector<8x128xf32>, vector<128x128xf32>, vector<8x128xf32> -> vector<8x128xf32>
    %c0_23 = arith.constant 0 : index
    %c0_24 = arith.constant 0 : index
    %43 = vector.load %arg7[%c0_23, %c0_24] : memref<1x128xf32, #tpu.memory_space<vmem>>, vector<1x128xf32>
    %44 = vector.broadcast %43 : vector<1x128xf32> to vector<8x128xf32>
    %45 = arith.addf %42, %44 : vector<8x128xf32>
    %cst_25 = arith.constant 3.000000e+00 : f32
    %46 = vector.broadcast %cst_25 : f32 to vector<8x128xf32>
    %47 = arith.mulf %46, %45 : vector<8x128xf32>
    %48 = math.absf %47 : vector<8x128xf32>
    %cst_26 = arith.constant 0.000000e+00 : f32
    %49 = vector.broadcast %cst_26 : f32 to vector<8x128xf32>
    %50 = arith.subf %49, %48 : vector<8x128xf32>
    %51 = math.exp %50 : vector<8x128xf32>
    %cst_27 = arith.constant 0.000000e+00 : f32
    %52 = vector.broadcast %cst_27 : f32 to vector<8x128xf32>
    %53 = arith.maximumf %45, %52 : vector<8x128xf32>
    %54 = math.log1p %51 : vector<8x128xf32>
    %cst_28 = arith.constant 0.333333343 : f32
    %55 = vector.broadcast %cst_28 : f32 to vector<8x128xf32>
    %56 = arith.mulf %55, %54 : vector<8x128xf32>
    %57 = arith.addf %53, %56 : vector<8x128xf32>
    %cst_29 = arith.constant 2.000000e+01 : f32
    %58 = vector.broadcast %cst_29 : f32 to vector<8x128xf32>
    %59 = arith.cmpf ogt, %47, %58 : vector<8x128xf32>
    %60 = arith.select %59, %45, %57 : vector<8x128xi1>, vector<8x128xf32>
    %c0_30 = arith.constant 0 : index
    %c0_31 = arith.constant 0 : index
    %61 = vector.load %arg8[%c0_30, %c0_31] : memref<128x384xf32, #tpu.memory_space<vmem>>, vector<128x384xf32>
    %cst_32 = arith.constant dense<0.000000e+00> : vector<8x384xf32>
    %62 = tpu.matmul %60, %61, %cst_32 {dimension_numbers = #tpu.dot_dimension_numbers<[1], [0], [0], [1], [0, 0, 1, 1], [], []>} : vector<8x128xf32>, vector<128x384xf32>, vector<8x384xf32> -> vector<8x384xf32>
    %c0_33 = arith.constant 0 : index
    %c0_34 = arith.constant 0 : index
    %63 = vector.load %arg9[%c0_33, %c0_34] : memref<1x384xf32, #tpu.memory_space<vmem>>, vector<1x384xf32>
    %64 = vector.broadcast %63 : vector<1x384xf32> to vector<8x384xf32>
    %65 = arith.addf %62, %64 : vector<8x384xf32>
    %c0_35 = arith.constant 0 : index
    %c0_36 = arith.constant 0 : index
    %66 = vector.load %arg10[%c0_35, %c0_36] : memref<8x384xf32, #tpu.memory_space<vmem>>, vector<8x384xf32>
    tpu.vector_store %arg10[%c0_35, %c0_36], %65 {strides = array<i32>} : memref<8x384xf32, #tpu.memory_space<vmem>>, vector<8x384xf32>,
    return
  }
  func.func @transform_0(%arg0: i32) -> (i32, i32) {
    %c0_i32 = arith.constant 0 : i32
    %c0_i32_0 = arith.constant 0 : i32
    return %arg0, %c0_i32 : i32, i32
  }
  func.func @transform_1(%arg0: i32) -> (i32, i32) {
    %c0_i32 = arith.constant 0 : i32
    %c0_i32_0 = arith.constant 0 : i32
    %c0_i32_1 = arith.constant 0 : i32
    return %c0_i32, %c0_i32_0 : i32, i32
  }
  func.func @transform_2(%arg0: i32) -> (i32, i32) {
    %c0_i32 = arith.constant 0 : i32
    %c0_i32_0 = arith.constant 0 : i32
    %c0_i32_1 = arith.constant 0 : i32
    return %c0_i32, %c0_i32_0 : i32, i32
  }
  func.func @transform_3(%arg0: i32) -> (i32, i32) {
    %c0_i32 = arith.constant 0 : i32
    %c0_i32_0 = arith.constant 0 : i32
    %c0_i32_1 = arith.constant 0 : i32
    return %c0_i32, %c0_i32_0 : i32, i32
  }
  func.func @transform_4(%arg0: i32) -> (i32, i32) {
    %c0_i32 = arith.constant 0 : i32
    %c0_i32_0 = arith.constant 0 : i32
    %c0_i32_1 = arith.constant 0 : i32
    return %c0_i32, %c0_i32_0 : i32, i32
  }
  func.func @transform_5(%arg0: i32) -> (i32, i32) {
    %c0_i32 = arith.constant 0 : i32
    %c0_i32_0 = arith.constant 0 : i32
    %c0_i32_1 = arith.constant 0 : i32
    return %c0_i32, %c0_i32_0 : i32, i32
  }
  func.func @transform_6(%arg0: i32) -> (i32, i32) {
    %c0_i32 = arith.constant 0 : i32
    %c0_i32_0 = arith.constant 0 : i32
    %c0_i32_1 = arith.constant 0 : i32
    return %c0_i32, %c0_i32_0 : i32, i32
  }
  func.func @transform_7(%arg0: i32) -> (i32, i32) {
    %c0_i32 = arith.constant 0 : i32
    %c0_i32_0 = arith.constant 0 : i32
    %c0_i32_1 = arith.constant 0 : i32
    return %c0_i32, %c0_i32_0 : i32, i32
  }
  func.func @transform_8(%arg0: i32) -> (i32, i32) {
    %c0_i32 = arith.constant 0 : i32
    %c0_i32_0 = arith.constant 0 : i32
    %c0_i32_1 = arith.constant 0 : i32
    return %c0_i32, %c0_i32_0 : i32, i32
  }
  func.func @transform_9(%arg0: i32) -> (i32, i32) {
    %c0_i32 = arith.constant 0 : i32
    %c0_i32_0 = arith.constant 0 : i32
    return %arg0, %c0_i32 : i32, i32
  }
}

</mosaic_0001>

<bundles_post_ra>
// kernel: tpu_custom_call.1
= control target key start
LH: loop header
LB: loop body
LE: loop exit
PB: predicated region body
PF: predicated region fallthrough
CT: control target
= control target key end

     0   :  { %14 = vsyncpa [#allocation3], 0  ;;  %s731_s0 = inlined_call_operand.hbm [shape: f32[8,10], index: 0, kind: input, shape index: {}]   ;;  %s732_s1 = inlined_call_operand.hbm [shape: f32[10,128], index: 1, kind: input, shape index: {}]   ;;  %s733_s2 = inlined_call_operand.vmem [shape: f32[1,128], index: 2, kind: input, shape index: {}]   ;;  %s734_s3 = inlined_call_operand.hbm [shape: f32[128,128], index: 3, kind: input, shape index: {}]   ;;  %s735_s4 = inlined_call_operand.vmem [shape: f32[1,128], index: 4, kind: input, shape index: {}]   ;;  %s736_s5 = inlined_call_operand.hbm [shape: f32[128,128], index: 5, kind: input, shape index: {}]   ;;  %s737_s6 = inlined_call_operand.hbm [shape: f32[1,128], index: 6, kind: input, shape index: {}]   ;;  %s738_s7 = inlined_call_operand.hbm [shape: f32[128,384], index: 7, kind: input, shape index: {}]   ;;  %s739_s8 = inlined_call_operand.vmem [shape: f32[1,384], index: 8, kind: input, shape index: {}]   ;;  %s740_s9 = inlined_call_operand.hbm [shape: f32[8,384], index: 9, kind: output, shape index: {}]  }
   0x1   :  { %15 = vsyncpa [#allocation6], 0 }
   0x2   :  { %16 = vsyncpa [#allocation9], 0 }
   0x3   :  { %17 = vsyncpa [#allocation12], 0  ;;  %s34_s11 = sshll.u32 %s732_s1, 4  ;;  %s35_s11 = int_to_ptr.hbm [resolvable:$true] %s34_s11 }
   0x4   :  { %18 = vsyncpa [#allocation4], 0  ;;  %s640_s12 = smov [#allocation5]   ;;  %s64_s16 = sshll.u32 %s736_s5, 4  ;;  %s65_s16 = int_to_ptr.hbm [resolvable:$true] %s64_s16 }
   0x5   :  { %s36_s13 = sshll.u32 %s640_s12, 4  ;;  %s641_s17 = smov 128   ;;  %s37_s13 = int_to_ptr.vmem [resolvable:$true] %s36_s13 }
   0x6   :  { %s642_s18 = smov 8   ;;  %s643_s19 = smov [#allocation8]  }
   0x7   :  { %42 = dma.hbm_to_vmem [thread:$0]  %s35_s11, 256, %s37_s13, [#allocation6], %s641_s17, %s641_s17, %s642_s18  }
   0x8   :  { %s66_s20 = sshll.u32 %s643_s19, 4  ;;  %s24_s23 = sshll.u32 %s731_s0, 4  ;;  %s67_s20 = int_to_ptr.vmem [resolvable:$true] %s66_s20  ;;  %s25_s23 = int_to_ptr.hbm [resolvable:$true] %s24_s23 }
   0x9   :  { %72 = dma.hbm_to_vmem [thread:$0]  %s65_s16, 2048, %s67_s20, [#allocation9], %s641_s17, %s641_s17, %s642_s18  }
   0xa   :  { %s49_s25 = sshll.u32 %s734_s3, 4  ;;  %s644_s26 = smov [#allocation2]   ;;  %s50_s25 = int_to_ptr.hbm [resolvable:$true] %s49_s25 }
   0xb   :  { %s26_s27 = sshll.u32 %s644_s26, 4  ;;  %s645_s5 = smov [#allocation7]   ;;  %s27_s27 = int_to_ptr.vmem [resolvable:$true] %s26_s27 }
   0xc   :  { %29 = dma.hbm_to_vmem [thread:$0]  %s25_s23, 128, %s27_s27, [#allocation3]  }
   0xd   :  { %s51_s28 = sshll.u32 %s645_s5, 4  ;;  %s78_s10 = sshll.u32 %s737_s6, 4  ;;  %s52_s28 = int_to_ptr.vmem [resolvable:$true] %s51_s28  ;;  %s79_s10 = int_to_ptr.hbm [resolvable:$true] %s78_s10 }
   0xe   :  { %57 = dma.hbm_to_vmem [thread:$0]  %s50_s25, 2048, %s52_s28, [#allocation6], %s641_s17, %s641_s17, %s642_s18  }
   0xf   :  { %s88_s12 = sshll.u32 %s738_s7, 4  ;;  %s646_s13 = smov [#allocation10]   ;;  %s89_s12 = int_to_ptr.hbm [resolvable:$true] %s88_s12 }
  0x10   :  { %s80_s3 = sshll.u32 %s646_s13, 4  ;;  %s647_s14 = smov [#allocation11]   ;;  %s81_s3 = int_to_ptr.vmem [resolvable:$true] %s80_s3 }
  0x11   :  { %83 = dma.hbm_to_vmem [thread:$0]  %s79_s10, 16, %s81_s3, [#allocation9]  }
  0x12   :  { %s90_s15 = sshll.u32 %s647_s14, 4  ;;  %s648_s16 = smov 384   ;;  %s91_s15 = int_to_ptr.vmem [resolvable:$true] %s90_s15 }
  0x13   :  { %s649_s19 = smov 24  }
  0x14   :  { %96 = dma.hbm_to_vmem [thread:$0]  %s89_s12, 6144, %s91_s15, [#allocation12], %s648_s16, %s648_s16, %s649_s19  }
  0x15   :  { %630 = dma.done.wait [#allocation3], 128  }
  0x16   :  { %631 = vsyncadd [#allocation3], 4294967168 }
  0x17   :  { %632 = dma.done.wait [#allocation6], 2304  }
  0x18   :  { %633 = vsyncadd [#allocation6], 4294964992 }
  0x19   :  { %634 = dma.done.wait [#allocation9], 2064  }
  0x1a   :  { %635 = vsyncadd [#allocation9], 4294965232 }
  0x1b   :  { %636 = dma.done.wait [#allocation12], 6144  }
  0x1c   :  { %637 = vsyncadd [#allocation12], 4294961152  ;;  %vm134_vm0 = vcmask 1041408   ;;  %v125_v0 = vld [vmem:[#allocation5 + $0x8] sm:$0x3]  ;;  %v124_v1 = vld [vmem:[#allocation5] sm:$0xff] }
  0x1d   :  { %434 = vmatpush.msk.msra.mxu0 %vm134_vm0, %v125_v0  ;;  %v123_v2 = vld [vmem:[#allocation2] sm:$0xff]  ;;  %vm130_vm1 = vcmask 80896   ;;  %v192_v3 = vld [vmem:[#allocation7 + $0x78] sm:$0xff]  ;;  %v191_v4 = vld [vmem:[#allocation7 + $0x70] sm:$0xff]  ;;  %s650_s20 = smov [#allocation13]   ;;  %s421_s1 = sshll.u32 %s740_s9, 4  ;;  %s422_s1 = int_to_ptr.hbm [resolvable:$true] %s421_s1 }
  0x1e   :  { %197 = vmatpush.msra.mxu1 %v192_v3  ;;  %v190_v5 = vld [vmem:[#allocation7 + $0x68] sm:$0xff]  ;;  %v189_v6 = vld [vmem:[#allocation7 + $0x60] sm:$0xff]  ;;  %v188_v7 = vld [vmem:[#allocation7 + $0x58] sm:$0xff]  ;;  %s419_s21 = sshll.u32 %s650_s20, 4  ;;  %s420_s21 = int_to_ptr.vmem [resolvable:$true] %s419_s21 }
  0x1f   :  { %153 = vmatpush.msra.mxu0 %v124_v1  ;;  %v187_v8 = vld [vmem:[#allocation7 + $0x50] sm:$0xff]  ;;  %v186_v9 = vld [vmem:[#allocation7 + $0x48] sm:$0xff]  ;;  %v185_v10 = vld [vmem:[#allocation7 + $0x40] sm:$0xff] }
  0x20   :  { %435 = vmatmul.msk.f32.vlgmr.msra.gmra.mxu0 %vm130_vm1, %v123_v2  ;;  %198 = vmatpush.msra.mxu1 %v191_v4  ;;  %v184_v11 = vld [vmem:[#allocation7 + $0x38] sm:$0xff]  ;;  %v183_v12 = vld [vmem:[#allocation7 + $0x30] sm:$0xff]  ;;  %v182_v13 = vld [vmem:[#allocation7 + $0x28] sm:$0xff] }
  0x21   :  { %v181_v14 = vld [vmem:[#allocation7 + $0x20] sm:$0xff]  ;;  %v180_v15 = vld [vmem:[#allocation7 + $0x18] sm:$0xff]  ;;  %v179_v16 = vld [vmem:[#allocation7 + $0x10] sm:$0xff] }
  0x22   :  { %199 = vmatpush.msra.mxu1 %v190_v5  ;;  %v447_v17 = vld [vmem:[%s733_s2] ss:$0 sm:$0xff]  ;;  %v177_v19 = vld [vmem:[#allocation7] sm:$0xff]  ;;  %v251_v39 = vld [vmem:[#allocation8 + $0x78] sm:$0xff] }
  0x23   :  { %v178_v18 = vld [vmem:[#allocation7 + $0x8] sm:$0xff]  ;;  %v250_v40 = vld [vmem:[#allocation8 + $0x70] sm:$0xff]  ;;  %256 = vmatpush.msra.mxu2 %v251_v39  ;;  %v248_v42 = vld [vmem:[#allocation8 + $0x60] sm:$0xff] }
  0x24   :  { %200 = vmatpush.msra.mxu1 %v189_v6  ;;  %v249_v41 = vld [vmem:[#allocation8 + $0x68] sm:$0xff]  ;;  %v247_v43 = vld [vmem:[#allocation8 + $0x58] sm:$0xff]  ;;  %v246_v44 = vld [vmem:[#allocation8 + $0x50] sm:$0xff] }
  0x25   :  { %257 = vmatpush.msra.mxu2 %v250_v40  ;;  %v245_v45 = vld [vmem:[#allocation8 + $0x48] sm:$0xff]  ;;  %v244_v46 = vld [vmem:[#allocation8 + $0x40] sm:$0xff]  ;;  %v243_v47 = vld [vmem:[#allocation8 + $0x38] sm:$0xff] }
  0x26   :  { %201 = vmatpush.msra.mxu1 %v188_v7  ;;  %v242_v48 = vld [vmem:[#allocation8 + $0x30] sm:$0xff]  ;;  %v241_v49 = vld [vmem:[#allocation8 + $0x28] sm:$0xff]  ;;  %v240_v50 = vld [vmem:[#allocation8 + $0x20] sm:$0xff] }
  0x27   :  { %258 = vmatpush.msra.mxu2 %v249_v41  ;;  %v239_v51 = vld [vmem:[#allocation8 + $0x18] sm:$0xff]  ;;  %v238_v52 = vld [vmem:[#allocation8 + $0x10] sm:$0xff]  ;;  %v448_v53 = vld [vmem:[%s735_s4] ss:$0 sm:$0xff] }
  0x28   :  { %202 = vmatpush.msra.mxu1 %v187_v8  ;;  %v237_v54 = vld [vmem:[#allocation8 + $0x8] sm:$0xff]  ;;  %v236_v55 = vld [vmem:[#allocation8] sm:$0xff] }
  0x29   :  { %259 = vmatpush.msra.mxu2 %v248_v42  ;;  %v314_v39 = vld [vmem:[#allocation11 + $0x98] sm:$0xff]  ;;  %v315_v40 = vld [vmem:[#allocation11 + $0xa0] sm:$0xff] }
  0x2a   :  { %203 = vmatpush.msra.mxu1 %v186_v9  ;;  %v310_v41 = vld [vmem:[#allocation11 + $0x78] sm:$0xff]  ;;  %v311_v42 = vld [vmem:[#allocation11 + $0x80] sm:$0xff] }
  0x2b   :  { %260 = vmatpush.msra.mxu2 %v247_v43  ;;  %v312_v43 = vld [vmem:[#allocation11 + $0x88] sm:$0xff] }
  0x2c   :  { %204 = vmatpush.msra.mxu1 %v185_v10 }
  0x2d   :  { %261 = vmatpush.msra.mxu2 %v246_v44  ;;  %v307_v44 = vld [vmem:[#allocation11 + $0x60] sm:$0xff] }
  0x2e   :  { %205 = vmatpush.msra.mxu1 %v184_v11  ;;  %v340_v11 = vld [vmem:[#allocation11 + $0x168] sm:$0xff] }
  0x2f   :  { %262 = vmatpush.msra.mxu2 %v245_v45  ;;  %351 = vmatpush.msra.mxu3 %v340_v11  ;;  %v308_v45 = vld [vmem:[#allocation11 + $0x68] sm:$0xff] }
  0x30   :  { %206 = vmatpush.msra.mxu1 %v183_v12  ;;  %v341_v12 = vld [vmem:[#allocation11 + $0x170] sm:$0xff] }
  0x31   :  { %263 = vmatpush.msra.mxu2 %v244_v46  ;;  %371 = vmatpush.msrb.mxu0 %v341_v12  ;;  %v309_v46 = vld [vmem:[#allocation11 + $0x70] sm:$0xff] }
  0x32   :  { %207 = vmatpush.msra.mxu1 %v182_v13  ;;  %v342_v13 = vld [vmem:[#allocation11 + $0x178] sm:$0xff] }
  0x33   :  { %264 = vmatpush.msra.mxu2 %v243_v47  ;;  %v304_v47 = vld [vmem:[#allocation11 + $0x48] sm:$0xff] }
  0x34   :  { %208 = vmatpush.msra.mxu1 %v181_v14  ;;  %v337_v14 = vld [vmem:[#allocation11 + $0x150] sm:$0xff] }
  0x35   :  { %265 = vmatpush.msra.mxu2 %v242_v48  ;;  %352 = vmatpush.msra.mxu3 %v337_v14  ;;  %v305_v48 = vld [vmem:[#allocation11 + $0x50] sm:$0xff] }
  0x36   :  { %209 = vmatpush.msra.mxu1 %v180_v15  ;;  %v338_v15 = vld [vmem:[#allocation11 + $0x158] sm:$0xff] }
  0x37   :  { %266 = vmatpush.msra.mxu2 %v241_v49  ;;  %372 = vmatpush.msrb.mxu0 %v338_v15  ;;  %v306_v49 = vld [vmem:[#allocation11 + $0x58] sm:$0xff]  ;;  %v343_v15 = vld [vmem:[%s739_s8] sm:$0x7] }
  0x38   :  { %210 = vmatpush.msra.mxu1 %v179_v16  ;;  %v339_v16 = vld [vmem:[#allocation11 + $0x160] sm:$0xff] }
  0x39   :  { %267 = vmatpush.msra.mxu2 %v240_v50  ;;  %v301_v50 = vld [vmem:[#allocation11 + $0x30] sm:$0xff] }
  0x3a   :  { %211 = vmatpush.msra.mxu1 %v178_v18  ;;  %v335_v18 = vld [vmem:[#allocation11 + $0x140] sm:$0xff] }
  0x3b   :  { %268 = vmatpush.msra.mxu2 %v239_v51  ;;  %373 = vmatpush.msrb.mxu0 %v335_v18  ;;  %v302_v51 = vld [vmem:[#allocation11 + $0x38] sm:$0xff] }
  0x3c   :  { %212 = vmatpush.msra.mxu1 %v177_v19  ;;  %v336_v19 = vld [vmem:[#allocation11 + $0x148] sm:$0xff] }
  0x3d   :  { %269 = vmatpush.msra.mxu2 %v238_v52  ;;  %v303_v52 = vld [vmem:[#allocation11 + $0x40] sm:$0xff] }
  0x3e   :  { %391 = vmatpush.msrb.mxu1 %v342_v13 }
  0x3f   :  { %270 = vmatpush.msra.mxu2 %v237_v54  ;;  %v298_v54 = vld [vmem:[#allocation11 + $0x18] sm:$0xff] }
  0x40   :  { %392 = vmatpush.msrb.mxu1 %v339_v16  ;;  %v346_v16 = vperm.slane %v343_v15, 1 }
  0x41   :  { %271 = vmatpush.msra.mxu2 %v236_v55  ;;  %v299_v55 = vld [vmem:[#allocation11 + $0x20] sm:$0xff] }
  0x42   :  { %393 = vmatpush.msrb.mxu1 %v336_v19 }
  0x9d   :  { %v155_v20 = vpop.f32.mrf.mxu0 }
  0x9e   :  { %v156_v21 = vadd.f32 %v447_v17, %v155_v20  ;;  %v334_v17 = vld [vmem:[#allocation11 + $0x138] sm:$0xff]  ;;  %v331_v20 = vld [vmem:[#allocation11 + $0x120] sm:$0xff] }
  0x9f   :  { %353 = vmatpush.msra.mxu3 %v334_v17  ;;  %v347_v17 = vperm.slane %v343_v15, 2 }
  0xa0   :  { %v158_v22 = vmul.f32 3.0, %v156_v21  ;;  %v163_v35 = vmax.f32 %v156_v21, 0.0 }
  0xa1   :  { %354 = vmatpush.msra.mxu3 %v331_v20 }
  0xa2   :  { %v159_v23 = vand.u32 2147483647, %v158_v22  ;;  %vm175_vm3 = vcmp.gt.f32.partialorder %v158_v22, 20.0  ;;  %v333_v22 = vld [vmem:[#allocation11 + $0x130] sm:$0xff] }
  0xa3   :  { %394 = vmatpush.msrb.mxu1 %v333_v22  ;;  %v345_v22 = vperm.slane %v343_v15, 0 }
  0xa4   :  { %v160_v24 = vsub.f32 0.0, %v159_v23  ;;  %v328_v23 = vld [vmem:[#allocation11 + $0x108] sm:$0xff] }
  0xa5   :  { %355 = vmatpush.msra.mxu3 %v328_v23 }
  0xa6   :  { %v161_v25 = vmul.f32 1.442695, %v160_v24  ;;  %v329_v24 = vld [vmem:[#allocation11 + $0x110] sm:$0xff] }
  0xa8   :  { %450 = vpow2.f32 %v161_v25  ;;  %v330_v25 = vld [vmem:[#allocation11 + $0x118] sm:$0xff] }
  0xa9   :  { %395 = vmatpush.msrb.mxu1 %v330_v25 }
  0xae   :  { %v451_v26 = vpop.eup %450 }
  0xaf   :  { %v164_v27 = vadd.f32 1.0, %v451_v26  ;;  %v167_v28 = vmul.f32 -0.5, %v451_v26  ;;  %v170_v30 = vand.u32 2147483647, %v451_v26 }
  0xb1   :  { %452 = vlog2.f32 %v164_v27  ;;  %v168_v29 = vadd.f32 1.0, %v167_v28  ;;  %vm171_vm2 = vcmp.lt.f32.partialorder %v170_v30, 0.0004427343  ;;  %v326_v27 = vld [vmem:[#allocation11 + $0xf8] sm:$0xff]  ;;  %v327_v28 = vld [vmem:[#allocation11 + $0x100] sm:$0xff] }
  0xb2   :  { %v323_v30 = vld [vmem:[#allocation11 + $0xe0] sm:$0xff]  ;;  %396 = vmatpush.msrb.mxu1 %v327_v28 }
  0xb3   :  { %v169_v33 = vmul.f32 %v451_v26, %v168_v29  ;;  %v325_v26 = vld [vmem:[#allocation11 + $0xf0] sm:$0xff]  ;;  %v322_v29 = vld [vmem:[#allocation11 + $0xd8] sm:$0xff] }
  0xb4   :  { %356 = vmatpush.msra.mxu3 %v325_v26 }
  0xb6   :  { %357 = vmatpush.msra.mxu3 %v322_v29 }
  0xb7   :  { %v453_v31 = vpop.eup %452 }
  0xb8   :  { %v166_v32 = vmul.f32 0.6931472, %v453_v31  ;;  %v324_v31 = vld [vmem:[#allocation11 + $0xe8] sm:$0xff] }
  0xb9   :  { %397 = vmatpush.msrb.mxu1 %v324_v31 }
  0xba   :  { %v172_v34 = vsel %vm171_vm2, %v169_v33, %v166_v32  ;;  %v319_v32 = vld [vmem:[#allocation11 + $0xc0] sm:$0xff]  ;;  %v320_v33 = vld [vmem:[#allocation11 + $0xc8] sm:$0xff] }
  0xbb   :  { %v173_v36 = vmul.f32 0.33333334, %v172_v34  ;;  %v321_v34 = vld [vmem:[#allocation11 + $0xd0] sm:$0xff]  ;;  %358 = vmatpush.msra.mxu3 %v319_v32 }
  0xbc   :  { %398 = vmatpush.msrb.mxu1 %v321_v34 }
  0xbd   :  { %v174_v37 = vadd.f32 %v173_v36, %v163_v35  ;;  %v316_v35 = vld [vmem:[#allocation11 + $0xa8] sm:$0xff]  ;;  %v317_v36 = vld [vmem:[#allocation11 + $0xb0] sm:$0xff] }
  0xbe   :  { %359 = vmatpush.msra.mxu3 %v316_v35 }
  0xbf   :  { %v176_v38 = vsel %vm175_vm3, %v156_v21, %v174_v37  ;;  %v332_v21 = vld [vmem:[#allocation11 + $0x128] sm:$0xff]  ;;  %v318_v37 = vld [vmem:[#allocation11 + $0xb8] sm:$0xff] }
  0xc0   :  { %213 = vmatmul.f32.vlgmr.msra.gmra.mxu1 %v176_v38  ;;  %374 = vmatpush.msrb.mxu0 %v332_v21  ;;  %v313_v38 = vld [vmem:[#allocation11 + $0x90] sm:$0xff] }
  0xc1   :  { %399 = vmatpush.msrb.mxu1 %v318_v37  ;;  %360 = vmatpush.msra.mxu3 %v313_v38 }
  0xc2   :  { %375 = vmatpush.msrb.mxu0 %v329_v24 }
  0xc3   :  { %400 = vmatpush.msrb.mxu1 %v315_v40  ;;  %361 = vmatpush.msra.mxu3 %v310_v41 }
  0xc4   :  { %376 = vmatpush.msrb.mxu0 %v326_v27 }
  0xc5   :  { %401 = vmatpush.msrb.mxu1 %v312_v43  ;;  %362 = vmatpush.msra.mxu3 %v307_v44 }
  0xc6   :  { %377 = vmatpush.msrb.mxu0 %v323_v30 }
  0xc7   :  { %402 = vmatpush.msrb.mxu1 %v309_v46  ;;  %363 = vmatpush.msra.mxu3 %v304_v47 }
  0xc8   :  { %378 = vmatpush.msrb.mxu0 %v320_v33 }
  0xc9   :  { %403 = vmatpush.msrb.mxu1 %v306_v49  ;;  %364 = vmatpush.msra.mxu3 %v301_v50 }
  0xca   :  { %379 = vmatpush.msrb.mxu0 %v317_v36 }
  0xcb   :  { %404 = vmatpush.msrb.mxu1 %v303_v52  ;;  %365 = vmatpush.msra.mxu3 %v298_v54 }
  0xcc   :  { %380 = vmatpush.msrb.mxu0 %v314_v39 }
  0xce   :  { %381 = vmatpush.msrb.mxu0 %v311_v42 }
  0xd0   :  { %382 = vmatpush.msrb.mxu0 %v308_v45 }
  0xd2   :  { %383 = vmatpush.msrb.mxu0 %v305_v48 }
  0xd4   :  { %384 = vmatpush.msrb.mxu0 %v302_v51 }
  0xd6   :  { %385 = vmatpush.msrb.mxu0 %v299_v55 }
 0x13d   :  { %v214_v56 = vpop.f32.mrf.mxu1 }
 0x13e   :  { %v215_v57 = vadd.f32 %v448_v53, %v214_v56  ;;  %v449_v53 = vld [vmem:[#allocation10] ss:$0 sm:$0xff]  ;;  %v300_v56 = vld [vmem:[#allocation11 + $0x28] sm:$0xff] }
 0x13f   :  { %405 = vmatpush.msrb.mxu1 %v300_v56 }
 0x140   :  { %v217_v58 = vmul.f32 3.0, %v215_v57  ;;  %v222_v7 = vmax.f32 %v215_v57, 0.0 }
 0x142   :  { %v218_v59 = vand.u32 2147483647, %v217_v58  ;;  %vm234_vm5 = vcmp.gt.f32.partialorder %v217_v58, 20.0  ;;  %v296_v58 = vld [vmem:[#allocation11 + $0x8] sm:$0xff] }
 0x143   :  { %386 = vmatpush.msrb.mxu0 %v296_v58 }
 0x144   :  { %v219_v60 = vsub.f32 0.0, %v218_v59 }
 0x146   :  { %v220_v61 = vmul.f32 1.442695, %v219_v60  ;;  %v297_v60 = vld [vmem:[#allocation11 + $0x10] sm:$0xff] }
 0x147   :  { %406 = vmatpush.msrb.mxu1 %v297_v60 }
 0x148   :  { %454 = vpow2.f32 %v220_v61 }
 0x14e   :  { %v455_v62 = vpop.eup %454 }
 0x14f   :  { %v223_v63 = vadd.f32 1.0, %v455_v62  ;;  %v226_v0 = vmul.f32 -0.5, %v455_v62  ;;  %v229_v2 = vand.u32 2147483647, %v455_v62 }
 0x151   :  { %456 = vlog2.f32 %v223_v63  ;;  %v227_v1 = vadd.f32 1.0, %v226_v0  ;;  %vm230_vm4 = vcmp.lt.f32.partialorder %v229_v2, 0.0004427343 }
 0x153   :  { %v228_v5 = vmul.f32 %v455_v62, %v227_v1 }
 0x157   :  { %v457_v3 = vpop.eup %456 }
 0x158   :  { %v225_v4 = vmul.f32 0.6931472, %v457_v3 }
 0x15a   :  { %v231_v6 = vsel %vm230_vm4, %v228_v5, %v225_v4 }
 0x15b   :  { %v232_v8 = vmul.f32 0.33333334, %v231_v6 }
 0x15d   :  { %v233_v9 = vadd.f32 %v232_v8, %v222_v7 }
 0x15f   :  { %v235_v10 = vsel %vm234_vm5, %v215_v57, %v233_v9  ;;  %v295_v57 = vld [vmem:[#allocation11] sm:$0xff] }
 0x160   :  { %272 = vmatmul.f32.vlgmr.msra.gmra.mxu2 %v235_v10  ;;  %366 = vmatpush.msra.mxu3 %v295_v57 }
 0x1e3   :  { %v273_v59 = vpop.f32.mrf.mxu2 }
 0x1e4   :  { %v274_v61 = vadd.f32 %v449_v53, %v273_v59 }
 0x1e6   :  { %v276_v62 = vmul.f32 3.0, %v274_v61  ;;  %v281_v11 = vmax.f32 %v274_v61, 0.0 }
 0x1e8   :  { %v277_v63 = vand.u32 2147483647, %v276_v62  ;;  %vm293_vm7 = vcmp.gt.f32.partialorder %v276_v62, 20.0 }
 0x1ea   :  { %v278_v0 = vsub.f32 0.0, %v277_v63 }
 0x1ec   :  { %v279_v1 = vmul.f32 1.442695, %v278_v0 }
 0x1ee   :  { %458 = vpow2.f32 %v279_v1 }
 0x1f4   :  { %v459_v2 = vpop.eup %458 }
 0x1f5   :  { %v282_v3 = vadd.f32 1.0, %v459_v2  ;;  %v285_v4 = vmul.f32 -0.5, %v459_v2  ;;  %v288_v6 = vand.u32 2147483647, %v459_v2 }
 0x1f7   :  { %460 = vlog2.f32 %v282_v3  ;;  %v286_v5 = vadd.f32 1.0, %v285_v4  ;;  %vm289_vm6 = vcmp.lt.f32.partialorder %v288_v6, 0.0004427343 }
 0x1f9   :  { %v287_v9 = vmul.f32 %v459_v2, %v286_v5 }
 0x1fd   :  { %v461_v7 = vpop.eup %460 }
 0x1fe   :  { %v284_v8 = vmul.f32 0.6931472, %v461_v7 }
 0x200   :  { %v290_v10 = vsel %vm289_vm6, %v287_v9, %v284_v8 }
 0x201   :  { %v291_v12 = vmul.f32 0.33333334, %v290_v10 }
 0x203   :  { %v292_v13 = vadd.f32 %v291_v12, %v281_v11 }
 0x205   :  { %v294_v14 = vsel %vm293_vm7, %v274_v61, %v292_v13 }
 0x206   :  { %367 = vmatmul.f32.vlgmr.msra.gmra.mxu3 %v294_v14  ;;  %387 = vmatmul.f32.vlgmr.msrb.gmra.mxu0 %v294_v14 }
 0x207   :  { %407 = vmatmul.f32.vlgmr.msrb.gmra.mxu1 %v294_v14 }
 0x283   :  { %v388_v18 = vpop.f32.mrf.mxu0 }
 0x284   :  { %v389_v19 = vadd.f32 %v388_v18, %v346_v16  ;;  %v408_v20 = vpop.f32.mrf.mxu1 }
 0x285   :  { %v409_v21 = vadd.f32 %v408_v20, %v347_v17 }
 0x286   :  { %412 = vst [vmem:[#allocation13 + $0x8] sm:$0xff] %v389_v19 }
 0x287   :  { %413 = vst [vmem:[#allocation13 + $0x10] sm:$0xff] %v409_v21 }
 0x289   :  { %v368_v23 = vpop.f32.mrf.mxu3 }
 0x28a   :  { %v369_v24 = vadd.f32 %v368_v23, %v345_v22 }
 0x28c   :  { %411 = vst [vmem:[#allocation13] sm:$0xff] %v369_v24 }
 0x28d   :  { %424 = dma.vmem_to_hbm [thread:$0]  %s420_s21, 384, %s422_s1, [#allocation4]  }
 0x28e   :  { %638 = dma.done.wait [#allocation4], 384  }
 0x28f   :  { %639 = vsyncadd [#allocation4], 4294966912 }
 0x290   :  { %429 = vsyncpa [#allocation3], 1 }
 0x291   :  { %430 = vsyncpa [#allocation6], 1 }
 0x292   :  { %431 = vsyncpa [#allocation9], 1 }
 0x293   :  { %432 = vsyncpa [#allocation12], 1 }
 0x294   :  { %433 = vsyncpa [#allocation4], 1 }

</bundles_post_ra>
